<compile_context>
chip_gen: v7x
topology: tpu7x:2x2x1
jax: 0.10.0
libtpu: 0.0.40
codegen_flags: <defaults>
</compile_context>

<pallas_src>
import functools

import jax
import jax.numpy as jnp
from jax.experimental import pallas as pl
from jax.experimental.pallas import tpu as pltpu


# CIFAR per-channel constants, folded into a single affine transform:
#   (x - mean) / stdev  ==  x * (1/stdev) + (-mean/stdev)
_MEAN = (0.4914, 0.4822, 0.4465)
_STDEV = (0.2023, 0.1994, 0.201)
_SCALE = tuple(1.0 / s for s in _STDEV)
_BIAS = tuple(-m / s for m, s in zip(_MEAN, _STDEV))


def _cifnorm_kernel(x_ref, o_ref, *, block_rows, num_channels):
    # x_ref / o_ref: (block_rows, H*W) tile of the flattened (N*C, H*W) array.
    # Row index -> channel index = row % num_channels (NCHW flattening order).
    row0 = pl.program_id(0) * block_rows
    rows = row0 + jax.lax.broadcasted_iota(jnp.int32, (block_rows, 1), 0)
    ch = rows % num_channels

    scale = jnp.where(
        ch == 0,
        jnp.float32(_SCALE[0]),
        jnp.where(ch == 1, jnp.float32(_SCALE[1]), jnp.float32(_SCALE[2])),
    )
    bias = jnp.where(
        ch == 0,
        jnp.float32(_BIAS[0]),
        jnp.where(ch == 1, jnp.float32(_BIAS[1]), jnp.float32(_BIAS[2])),
    )

    x = x_ref[...].astype(jnp.float32)
    o_ref[...] = (x * scale + bias).astype(o_ref.dtype)


def cifnorm(x: jax.Array, *, max_tile_bytes: int = 2 * 1024 * 1024) -> jax.Array:
    """CIFAR normalization for NCHW input with 3 channels."""
    n, c, h, w = x.shape
    assert c == 3, "CifNorm expects 3 channels (CIFAR RGB)"

    rows = n * c
    hw = h * w
    x2 = x.reshape(rows, hw)  # free: NCHW is contiguous with HW innermost

    # Lane-dense row tiles: (block_rows, H*W).  Cap tile size so that
    # double-buffered input+output (4 x tile) fits comfortably in scoped VMEM
    # on all generations.
    itemsize = jnp.dtype(x.dtype).itemsize
    br = max_tile_bytes // (hw * itemsize)
    br = max(8, (br // 8) * 8)          # multiple of 8 sublanes
    if br >= rows:
        br = rows                       # full-extent block is always layout-legal
    grid = (pl.cdiv(rows, br),)

    kernel = functools.partial(_cifnorm_kernel, block_rows=br, num_channels=c)

    out2 = pl.pallas_call(
        kernel,
        out_shape=jax.ShapeDtypeStruct((rows, hw), x.dtype),
        grid_spec=pltpu.PrefetchScalarGridSpec(
            num_scalar_prefetch=0,
            grid=grid,
            in_specs=[pl.BlockSpec((br, hw), lambda i: (i, 0))],
            out_specs=pl.BlockSpec((br, hw), lambda i: (i, 0)),
        ),
        compiler_params=pltpu.CompilerParams(
            dimension_semantics=("parallel",),
        ),
        cost_estimate=pl.CostEstimate(
            flops=2 * rows * hw,
            transcendentals=0,
            bytes_accessed=2 * rows * hw * itemsize,
        ),
    )(x2)
    return out2.reshape(n, c, h, w)


if __name__ == "__main__":
    key = jax.random.PRNGKey(0)
    x = jax.random.uniform(key, (2, 3, 16, 16), dtype=jnp.float32)

    out = jax.block_until_ready(cifnorm(x))

    # Reference check in plain JAX (exact divide form, as in the PyTorch module).
    mean = jnp.asarray(_MEAN, dtype=jnp.float32)[None, :, None, None]
    stdev = jnp.asarray(_STDEV, dtype=jnp.float32)[None, :, None, None]
    ref = (x - mean) / stdev
    assert out.shape == ref.shape and out.dtype == ref.dtype
    assert jnp.allclose(out, ref, rtol=1e-5, atol=1e-5), "mismatch vs reference"

    print("KERNEL_OK")
</pallas_src>

<mosaic_0001>
module attributes {stable_mosaic.version = 11 : i64} {
  func.func @_cifnorm_kernel(%arg0: i32, %arg1: memref<6x256xf32, #tpu.memory_space<vmem>>, %arg2: memref<6x256xf32, #tpu.memory_space<vmem>>) attributes {dimension_semantics = [#tpu.dimension_semantics<parallel>], iteration_bounds = array<i64: 1>, scalar_prefetch = 0 : i64, scratch_operands = 0 : i64, tpu.core_type = #tpu.core_type<tc>, window_params = [{transform_indices = @transform_0, window_bounds = array<i64: 6, 256>}, {transform_indices = @transform_1, window_bounds = array<i64: 6, 256>}]} {
    %c6_i32 = arith.constant 6 : i32
    %0 = arith.muli %arg0, %c6_i32 : i32
    %1 = tpu.iota {dimensions = array<i32: 0>} : vector<6x1xi32>
    %2 = vector.broadcast %0 : i32 to vector<6x1xi32>
    %3 = arith.addi %2, %1 : vector<6x1xi32>
    %c3_i32 = arith.constant 3 : i32
    %c0_i32 = arith.constant 0 : i32
    %4 = arith.cmpi eq, %c3_i32, %c0_i32 : i32
    %c1_i32 = arith.constant 1 : i32
    %5 = arith.select %4, %c1_i32, %c3_i32 : i32
    %6 = vector.broadcast %5 : i32 to vector<6x1xi32>
    %7 = arith.remsi %3, %6 : vector<6x1xi32>
    %c0_i32_0 = arith.constant 0 : i32
    %8 = vector.broadcast %c0_i32_0 : i32 to vector<6x1xi32>
    %9 = arith.cmpi ne, %7, %8 : vector<6x1xi32>
    %c0_i32_1 = arith.constant 0 : i32
    %10 = vector.broadcast %c0_i32_1 : i32 to vector<6x1xi32>
    %11 = arith.cmpi slt, %7, %10 : vector<6x1xi32>
    %c0_i32_2 = arith.constant 0 : i32
    %12 = arith.cmpi slt, %5, %c0_i32_2 : i32
    %13 = vector.broadcast %12 : i1 to vector<6x1xi1>
    %14 = vector.broadcast %13 : vector<6x1xi1> to vector<6x1xi1>
    %15 = arith.xori %11, %14 : vector<6x1xi1>
    %16 = arith.andi %15, %9 : vector<6x1xi1>
    %17 = vector.broadcast %5 : i32 to vector<6x1xi32>
    %18 = arith.addi %7, %17 : vector<6x1xi32>
    %19 = arith.select %16, %18, %7 : vector<6x1xi1>, vector<6x1xi32>
    %c0_i32_3 = arith.constant 0 : i32
    %20 = vector.broadcast %c0_i32_3 : i32 to vector<6x1xi32>
    %21 = arith.cmpi eq, %19, %20 : vector<6x1xi32>
    %c1_i32_4 = arith.constant 1 : i32
    %22 = vector.broadcast %c1_i32_4 : i32 to vector<6x1xi32>
    %23 = arith.cmpi eq, %19, %22 : vector<6x1xi32>
    %cst = arith.constant 5.01504517 : f32
    %cst_5 = arith.constant 4.97512436 : f32
    %24 = vector.broadcast %cst : f32 to vector<6x1xf32>
    %25 = vector.broadcast %cst_5 : f32 to vector<6x1xf32>
    %26 = arith.select %23, %24, %25 : vector<6x1xi1>, vector<6x1xf32>
    %cst_6 = arith.constant 4.94315386 : f32
    %27 = vector.broadcast %cst_6 : f32 to vector<6x1xf32>
    %28 = arith.select %21, %27, %26 : vector<6x1xi1>, vector<6x1xf32>
    %c0_i32_7 = arith.constant 0 : i32
    %29 = vector.broadcast %c0_i32_7 : i32 to vector<6x1xi32>
    %30 = arith.cmpi eq, %19, %29 : vector<6x1xi32>
    %c1_i32_8 = arith.constant 1 : i32
    %31 = vector.broadcast %c1_i32_8 : i32 to vector<6x1xi32>
    %32 = arith.cmpi eq, %19, %31 : vector<6x1xi32>
    %cst_9 = arith.constant -2.41825485 : f32
    %cst_10 = arith.constant -2.22139311 : f32
    %33 = vector.broadcast %cst_9 : f32 to vector<6x1xf32>
    %34 = vector.broadcast %cst_10 : f32 to vector<6x1xf32>
    %35 = arith.select %32, %33, %34 : vector<6x1xi1>, vector<6x1xf32>
    %cst_11 = arith.constant -2.4290657 : f32
    %36 = vector.broadcast %cst_11 : f32 to vector<6x1xf32>
    %37 = arith.select %30, %36, %35 : vector<6x1xi1>, vector<6x1xf32>
    %c0 = arith.constant 0 : index
    %c0_12 = arith.constant 0 : index
    %38 = vector.load %arg1[%c0, %c0_12] : memref<6x256xf32, #tpu.memory_space<vmem>>, vector<6x256xf32>
    %39 = vector.broadcast %28 : vector<6x1xf32> to vector<6x256xf32>
    %40 = arith.mulf %38, %39 : vector<6x256xf32>
    %41 = vector.broadcast %37 : vector<6x1xf32> to vector<6x256xf32>
    %42 = arith.addf %40, %41 : vector<6x256xf32>
    %c0_13 = arith.constant 0 : index
    %c0_14 = arith.constant 0 : index
    %43 = vector.load %arg2[%c0_13, %c0_14] : memref<6x256xf32, #tpu.memory_space<vmem>>, vector<6x256xf32>
    tpu.vector_store %arg2[%c0_13, %c0_14], %42 {strides = array<i32>} : memref<6x256xf32, #tpu.memory_space<vmem>>, vector<6x256xf32>,
    return
  }
  func.func @transform_0(%arg0: i32) -> (i32, i32) {
    %c0_i32 = arith.constant 0 : i32
    %c0_i32_0 = arith.constant 0 : i32
    return %arg0, %c0_i32 : i32, i32
  }
  func.func @transform_1(%arg0: i32) -> (i32, i32) {
    %c0_i32 = arith.constant 0 : i32
    %c0_i32_0 = arith.constant 0 : i32
    return %arg0, %c0_i32 : i32, i32
  }
}

</mosaic_0001>

<bundles_post_ra>
// kernel: tpu_custom_call.1
= control target key start
LH: loop header
LB: loop body
LE: loop exit
PB: predicated region body
PF: predicated region fallthrough
CT: control target
= control target key end

     0   :  { %6 = vsyncpa [#allocation3], 0  ;;  %s167_s0 = inlined_call_operand.hbm [shape: f32[6,256], index: 0, kind: input, shape index: {}]   ;;  %s168_s1 = inlined_call_operand.hbm [shape: f32[6,256], index: 1, kind: output, shape index: {}]  }
   0x1   :  { %7 = vsyncpa [#allocation4], 0  ;;  %s125_s6 = smov [#allocation2]   ;;  %s77_s10 = scalar_lea.hbm %s167_s0, 256 }
   0x2   :  { %s14_s7 = sshll.u32 %s125_s6, 4  ;;  %p78_p0 = scmp.ne.s32.totalorder %s167_s0, %s77_s10  ;;  %s15_s7 = int_to_ptr.vmem [resolvable:$true] %s14_s7 }
   0x3   :  { %p81_p1 = scmp.lt.u32.totalorder %s77_s10, %s167_s0 }
   0x5   :  { %p83_p2 = pnand %p81_p1, %p78_p0 }
   0x7   :  { %86 = shalt.err (!%p83_p2)
}
   0x8   :  { %s87_s15 = scalar_lea.vmem %s15_s7, 256  ;;  %p92_p4 = scmp.lt.s32.totalorder %s15_s7, %s15_s7 }
   0x9   :  { %p88_p3 = scmp.ne.s32.totalorder %s15_s7, %s87_s15  ;;  %p93_p5 = scmp.lt.s32.totalorder %s87_s15, %s87_s15 }
   0xb   :  { %p94_p6 = por %p93_p5, %p92_p4 }
   0xd   :  { %p95_p7 = pnand %p94_p6, %p88_p3 }
   0xf   :  { %98 = shalt.err (!%p95_p7)
}
  0x10   :  { %17 = dma.hbm_to_vmem [thread:$0]  %s167_s0, 256, %s15_s7, [#allocation3]  }
  0x11   :  { %121 = dma.done.wait [#allocation3], 256  }
  0x12   :  { %122 = vsyncadd [#allocation3], 4294967040  ;;  %v22_v0 = vlaneseq  ;;  %v48_v9 = vld [vmem:[#allocation2] sm:$0x3f]  ;;  %v49_v10 = vld [vmem:[#allocation2 + $0x8] sm:$0x3f] }
  0x13   :  { %v126_v11 = vmov 4.9751244   ;;  %v127_v13 = vmov -2.221393   ;;  %s128_s0 = smov [#allocation5]  }
  0x14   :  { %v23_v1 = vshrl.u32 %v22_v0, 7  ;;  %s62_s18 = sshll.u32 %s128_s0, 4  ;;  %s63_s18 = int_to_ptr.vmem [resolvable:$true] %s62_s18 }
  0x15   :  { %s99_s19 = scalar_lea.vmem %s63_s18, 256  ;;  %p104_p9 = scmp.lt.s32.totalorder %s63_s18, %s63_s18 }
  0x16   :  { %v151_v2 = vmul.u32.u64.low 2863311531, %v23_v1  ;;  %v152_v3 = vmul.u32.u64.high 2863311531, %v23_v1, %v151_v2  ;;  %p100_p8 = scmp.ne.s32.totalorder %s63_s18, %s99_s19  ;;  %p105_p10 = scmp.lt.s32.totalorder %s99_s19, %s99_s19 }
  0x18   :  { %v32_v4 = vshrl.u32 %v152_v3, 1  ;;  %p106_p11 = por %p105_p10, %p104_p9 }
  0x1a   :  { %v33_v5 = vmul.u32 3, %v32_v4  ;;  %p107_p12 = pnand %p106_p11, %p100_p8 }
  0x1c   :  { %v34_v6 = vsub.s32 %v23_v1, %v33_v5 }
  0x1e   :  { %vm37_vm0 = vcmp.ne.s32.totalorder %v34_v6, 0  ;;  %vm38_vm1 = vcmp.lt.s32.totalorder %v34_v6, 0  ;;  %v40_v7 = vadd.s32 3, %v34_v6 }
  0x1f   :  { %vm39_vm2 = vmand %vm38_vm1, %vm37_vm0 }
  0x20   :  { %v41_v8 = vsel %vm39_vm2, %v40_v7, %v34_v6 }
  0x21   :  { %vm42_vm3 = vcmp.eq.s32.totalorder %v41_v8, 0  ;;  %vm43_vm4 = vcmp.eq.s32.totalorder %v41_v8, 1 }
  0x22   :  { %v44_v12 = vsel %vm43_vm4, 5.015045, %v126_v11  ;;  %v46_v14 = vsel %vm43_vm4, -2.4182549, %v127_v13 }
  0x23   :  { %v45_v15 = vsel %vm42_vm3, 4.943154, %v44_v12  ;;  %v47_v16 = vsel %vm42_vm3, -2.4290657, %v46_v14 }
  0x24   :  { %v50_v17 = vmul.f32 %v48_v9, %v45_v15  ;;  %v51_v18 = vmul.f32 %v49_v10, %v45_v15 }
  0x26   :  { %v52_v19 = vadd.f32 %v50_v17, %v47_v16  ;;  %v53_v20 = vadd.f32 %v51_v18, %v47_v16 }
  0x28   :  { %54 = vst [vmem:[#allocation5] sm:$0x3f] %v52_v19  ;;  %55 = vst [vmem:[#allocation5 + $0x8] sm:$0x3f] %v53_v20 }
  0x29   :  { %110 = shalt.err (!%p107_p12)
}
  0x2a   :  { %s111_s22 = scalar_lea.hbm %s168_s1, 256 }
  0x2b   :  { %p112_p13 = scmp.ne.s32.totalorder %s168_s1, %s111_s22  ;;  %p115_p0 = scmp.lt.u32.totalorder %s111_s22, %s168_s1 }
  0x2d   :  { %p117_p1 = pnand %p115_p0, %p112_p13 }
  0x2f   :  { %120 = shalt.err (!%p117_p1)
}
  0x30   :  { %65 = dma.vmem_to_hbm [thread:$0]  %s63_s18, 256, %s168_s1, [#allocation4]  }
  0x31   :  { %123 = dma.done.wait [#allocation4], 256  }
  0x32   :  { %124 = vsyncadd [#allocation4], 4294967040 }
  0x33   :  { %69 = vsyncpa [#allocation3], 1 }
  0x34   :  { %70 = vsyncpa [#allocation4], 1 }

</bundles_post_ra>
